<compile_context>
chip_gen: v5e
topology: v5e:2x2
jax: 0.10.0
libtpu: 0.0.40
codegen_flags: <defaults>
</compile_context>

<pallas_src>
import functools

import jax
import jax.numpy as jnp
from jax import lax
from jax.experimental import pallas as pl
from jax.experimental.pallas import tpu as pltpu


def _round_up(x, m):
    return ((x + m - 1) // m) * m


def _tpu_vmem_capacity_bytes():
    try:
        info = pltpu.get_tpu_info()
        cap = getattr(info, "vmem_capacity_bytes", None)
        if cap:
            return int(cap)
    except Exception:
        pass
    return 64 * 1024 * 1024  # conservative default: v7x per-TensorCore VMEM


# ---------------------------------------------------------------------------------------------
# shared per-tile math: renorm (Embedding max_norm=1), score, BCE-with-logits, loss accumulation
# ---------------------------------------------------------------------------------------------
def _accumulate_loss(lamb_half, inv_b, ne, nb, blm_ref, loss_ref):
    tb, d_pad = ne.shape

    def renorm(e):
        # nn.Embedding(max_norm=1): rescale rows whose L2 norm exceeds 1 (rsqrt -> EUP slot).
        n2 = jnp.sum(e * e, axis=1, keepdims=True)
        return e * jnp.where(n2 > 1.0, lax.rsqrt(n2), 1.0)

    ne = renorm(ne)
    nb = renorm(nb)

    # score = (node_emb * neigh_emb).sum(dim=1) + bias, produced LANE-DENSE as (1, TB) on the MXU:
    #   ones(1, D) . prod(TB, D)^T  -- avoids (TB, 1)-column BCE transcendentals and any XLU
    #   transpose.  HIGHEST precision keeps the f32 reduction exact.
    prod = ne * nb
    ones_row = jnp.ones((1, d_pad), jnp.float32)
    score = lax.dot_general(ones_row, prod, (((1,), (1,)), ((), ())),
                            preferred_element_type=jnp.float32,
                            precision=lax.Precision.HIGHEST)              # (1, TB)

    blm = blm_ref[...]                    # (3, TB): rows = [bias, label, valid-mask]
    bias = blm[0:1, :]
    label = blm[1:2, :]
    mask = blm[2:3, :]                    # 0 for padded rows

    score = score + bias
    # numerically-stable BCE-with-logits, per element (lane-dense)
    bce = jnp.maximum(score, 0.0) - score * label + jnp.log1p(jnp.exp(-jnp.abs(score)))

    # accumulate:  mean(bce over real B)  +  lamb * 0.5 * sum(bias^2)
    loss_ref[...] += (inv_b * jnp.sum(bce * mask, keepdims=True)
                      + lamb_half * jnp.sum(bias * bias * mask, keepdims=True))


# ---------------------------------------------------------------------------------------------
# fast path: embedding table resident in VMEM, gather = one-hot @ table on the MXU
# ---------------------------------------------------------------------------------------------
def _disc_loss_resident_kernel(lamb_half, inv_b,
                               ids_ref,    # (TB, 2) int32: [:,0]=node ids, [:,1]=neighbor ids
                               tbl_ref,    # (n_pad, D_pad) f32 table, grid-invariant (resident)
                               blm_ref,    # (3, TB) f32: bias / label / valid-mask
                               loss_ref):  # (1, 1) accumulated loss (resident output)
    i = pl.program_id(0)

    @pl.when(i == 0)
    def _():
        loss_ref[...] = jnp.zeros_like(loss_ref)

    tb = ids_ref.shape[0]
    n_pad = tbl_ref.shape[0]

    ids = ids_ref[...]                                            # (TB, 2)
    col = lax.broadcasted_iota(jnp.int32, (tb, n_pad), 1)
    tbl = tbl_ref[...]
    # one-hot gather on the MXU; HIGHEST precision makes the "gather" exact in f32.
    ne = jnp.dot((col == ids[:, 0:1]).astype(jnp.float32), tbl,
                 preferred_element_type=jnp.float32, precision=lax.Precision.HIGHEST)
    nb = jnp.dot((col == ids[:, 1:2]).astype(jnp.float32), tbl,
                 preferred_element_type=jnp.float32, precision=lax.Precision.HIGHEST)

    _accumulate_loss(lamb_half, inv_b, ne, nb, blm_ref, loss_ref)


# ---------------------------------------------------------------------------------------------
# fallback path: table stays in HBM, manual double-buffered per-row DMA gather
# ---------------------------------------------------------------------------------------------
def _disc_loss_dma_kernel(lamb_half, inv_b,
                          nid_ref, gid_ref,   # scalar-prefetched ids (SMEM int32[B_pad])
                          emd_hbm,            # (n_node, D_pad) table, left in HBM (ANY)
                          blm_ref,            # (3, TB)
                          loss_ref,           # (1, 1)
                          nbuf, gbuf, sem):   # VMEM (2, TB, D_pad) x2, DMA sem (2,) [per slot]
    i = pl.program_id(0)
    nt = pl.num_programs(0)
    tb = nbuf.shape[1]

    UNROLL = 8  # tb is always a multiple of 8

    def start_gather(tile, slot):
        base = tile * tb

        @pl.loop(0, tb // UNROLL)
        def _(step):
            r0 = step * UNROLL
            for u in range(UNROLL):                      # unrolled descriptor issue
                r = r0 + u
                nid = nid_ref[base + r]
                gid = gid_ref[base + r]
                pltpu.make_async_copy(emd_hbm.at[nid], nbuf.at[slot, r], sem.at[slot]).start()
                pltpu.make_async_copy(emd_hbm.at[gid], gbuf.at[slot, r], sem.at[slot]).start()

    def wait_gather(slot):
        # DMA semaphores count bytes: two (TB, D_pad)-sized waits on the slot's semaphore cover
        # all 2*TB per-row copies issued for this slot (no per-row waits).
        pltpu.make_async_copy(emd_hbm.at[pl.ds(0, tb)], nbuf.at[slot], sem.at[slot]).wait()
        pltpu.make_async_copy(emd_hbm.at[pl.ds(0, tb)], gbuf.at[slot], sem.at[slot]).wait()

    @pl.when(i == 0)
    def _():
        loss_ref[...] = jnp.zeros_like(loss_ref)
        start_gather(0, 0)                 # prime slot 0

    slot = i % 2

    @pl.when(i + 1 < nt)
    def _():
        start_gather(i + 1, 1 - slot)      # issue next tile's gather BEFORE waiting on this one

    wait_gather(slot)

    _accumulate_loss(lamb_half, inv_b, nbuf[slot], gbuf[slot], blm_ref, loss_ref)


# ---------------------------------------------------------------------------------------------
# wrapper
# ---------------------------------------------------------------------------------------------
def discriminator_forward(node_emd, bias_vector, node_ids, neighbor_ids, label,
                          *, lamb, tile_b=512, force_dma_gather=False):
    """TaxoGAN Discriminator.forward: scalar BCE-with-logits loss + lamb * l2_loss(bias).

    node_emd: [n_node, D] embedding table; bias_vector: [n_node];
    node_ids / neighbor_ids: [B] int; label: [B].  Returns the scalar loss (float32).
    """
    node_emd = node_emd.astype(jnp.float32)
    bias_vector = bias_vector.astype(jnp.float32)
    label = label.astype(jnp.float32)

    B = int(node_ids.shape[0])
    n_node, D = node_emd.shape
    D_pad = _round_up(D, 128)            # lane-dense rows: bigger DMAs, unmasked vreg work
    n_pad = _round_up(n_node, 128)

    cap = _tpu_vmem_capacity_bytes()
    table_bytes = n_pad * D_pad * 4
    # Resident fast path: table DMA'd once and kept in VMEM across the whole grid.
    # Conservative budget leaves room for possible double-buffering of the invariant block plus
    # the other blocks; the one-hot gather additionally caps n_pad so MXU work stays trivial.
    use_resident = ((not force_dma_gather)
                    and table_bytes <= int(cap * 0.4)
                    and n_pad <= 8192)

    # Batch tile: multiple of 8 sublanes; with multiple tiles it must also be a multiple of 128
    # so the lane-dense (3, TB) bias/label/mask block satisfies the (8, 128) constraint.
    TB = _round_up(min(int(tile_b), B), 8)
    if TB < B:
        TB = _round_up(TB, 128)
    if not use_resident:
        assert n_node >= TB, (
            f"DMA-gather path needs n_node >= batch tile for the bulk-wait descriptor "
            f"(n_node={n_node}, TB={TB}); lower tile_b or let the resident path handle it.")
    B_pad = _round_up(B, TB)
    num_tiles = B_pad // TB
    pad = B_pad - B

    nid = jnp.pad(node_ids.astype(jnp.int32), (0, pad))
    gid = jnp.pad(neighbor_ids.astype(jnp.int32), (0, pad))

    # tiny wrapper-side gather/packing: bias, label, valid-mask packed lane-dense as (3, B_pad)
    bias = jnp.take(bias_vector, neighbor_ids, axis=0)
    blm = jnp.pad(jnp.stack([bias, label, jnp.ones((B,), jnp.float32)], axis=0),
                  ((0, 0), (0, pad)))

    # NOTE: callers that keep the table stored pre-padded to D_pad make this pad a no-op.
    tbl = jnp.pad(node_emd, ((0, 0), (0, D_pad - D)))

    consts = (0.5 * float(lamb), 1.0 / float(B))

    if use_resident:
        tbl_res = jnp.pad(tbl, ((0, n_pad - n_node), (0, 0)))          # (n_pad, D_pad)
        ids2 = jnp.stack([nid, gid], axis=1)                           # (B_pad, 2)
        vmem_limit = min(int(cap * 0.9), 2 * table_bytes + (32 << 20))
        loss = pl.pallas_call(
            functools.partial(_disc_loss_resident_kernel, *consts),
            out_shape=jax.ShapeDtypeStruct((1, 1), jnp.float32),
            grid_spec=pltpu.PrefetchScalarGridSpec(
                num_scalar_prefetch=0,
                grid=(num_tiles,),
                in_specs=[
                    pl.BlockSpec((TB, 2), lambda i: (i, 0)),            # ids tile
                    pl.BlockSpec((n_pad, D_pad), lambda i: (0, 0)),     # table: grid-invariant
                    pl.BlockSpec((3, TB), lambda i: (0, i)),            # bias/label/mask tile
                ],
                out_specs=pl.BlockSpec((1, 1), lambda i: (0, 0)),
            ),
            compiler_params=pltpu.CompilerParams(
                dimension_semantics=("arbitrary",),
                vmem_limit_bytes=vmem_limit),
        )(ids2, tbl_res, blm)
    else:
        scratch_bytes = 2 * 2 * TB * D_pad * 4
        vmem_limit = min(int(cap * 0.9), scratch_bytes + (32 << 20))
        loss = pl.pallas_call(
            functools.partial(_disc_loss_dma_kernel, *consts),
            out_shape=jax.ShapeDtypeStruct((1, 1), jnp.float32),
            grid_spec=pltpu.PrefetchScalarGridSpec(
                num_scalar_prefetch=2,
                grid=(num_tiles,),
                in_specs=[
                    pl.BlockSpec(memory_space=pl.ANY),                  # table stays in HBM
                    pl.BlockSpec((3, TB), lambda i, nid_r, gid_r: (0, i)),
                ],
                out_specs=pl.BlockSpec((1, 1), lambda i, nid_r, gid_r: (0, 0)),
                scratch_shapes=[
                    pltpu.VMEM((2, TB, D_pad), jnp.float32),            # node rows, 2 slots
                    pltpu.VMEM((2, TB, D_pad), jnp.float32),            # neighbor rows, 2 slots
                    pltpu.SemaphoreType.DMA((2,)),                      # one semaphore per slot
                ],
            ),
            compiler_params=pltpu.CompilerParams(
                dimension_semantics=("arbitrary",),
                vmem_limit_bytes=vmem_limit),
        )(nid, gid, tbl, blm)
    return loss[0, 0]


# ---------------------------------------------------------------------------------------------
# pure-JAX reference
# ---------------------------------------------------------------------------------------------
def _reference_forward(node_emd, bias_vector, node_ids, neighbor_ids, label, lamb):
    node_emd = node_emd.astype(jnp.float32)

    def renorm(e):
        n2 = jnp.sum(e * e, axis=1, keepdims=True)
        return e * jnp.where(n2 > 1.0, lax.rsqrt(n2), 1.0)

    ne = renorm(jnp.take(node_emd, node_ids, axis=0))
    nb = renorm(jnp.take(node_emd, neighbor_ids, axis=0))
    bias = jnp.take(bias_vector.astype(jnp.float32), neighbor_ids, axis=0)
    lab = label.astype(jnp.float32)
    score = jnp.sum(ne * nb, axis=1) + bias
    bce = jnp.maximum(score, 0.0) - score * lab + jnp.log1p(jnp.exp(-jnp.abs(score)))
    return jnp.mean(bce) + lamb * 0.5 * jnp.sum(bias * bias)


if __name__ == "__main__":
    def run_case(case_id, n_node, emd_size, batch, tile_b, force_dma):
        k = jax.random.fold_in(jax.random.PRNGKey(0), case_id)
        k1, k2, k3, k4, k5 = jax.random.split(k, 5)
        lamb = 1e-5

        node_emd = 0.5 * jax.random.normal(k1, (n_node, emd_size), dtype=jnp.float32)
        bias_vector = 0.1 * jax.random.normal(k5, (n_node,), dtype=jnp.float32)
        node_ids = jax.random.randint(k2, (batch,), 0, n_node, dtype=jnp.int32)
        neighbor_ids = jax.random.randint(k3, (batch,), 0, n_node, dtype=jnp.int32)
        label = jax.random.bernoulli(k4, 0.5, (batch,)).astype(jnp.float32)

        loss = discriminator_forward(node_emd, bias_vector, node_ids, neighbor_ids, label,
                                     lamb=lamb, tile_b=tile_b, force_dma_gather=force_dma)
        jax.block_until_ready(loss)

        ref = _reference_forward(node_emd, bias_vector, node_ids, neighbor_ids, label, lamb)
        err = float(jnp.abs(loss - ref))
        tol = 1e-4 + 1e-4 * float(jnp.abs(ref))
        if not err < tol:
            raise AssertionError(
                f"case {case_id}: kernel={float(loss)} ref={float(ref)} err={err}")

    # resident-table fast path, single batch tile, padded rows masked (B=20 -> B_pad=24)
    run_case(0, n_node=64, emd_size=32, batch=20, tile_b=512, force_dma=False)
    # resident-table fast path, 3 batch tiles: exercises the (1,1) loss accumulator + masking
    run_case(1, n_node=64, emd_size=32, batch=300, tile_b=128, force_dma=False)
    # HBM DMA-gather fallback: double-buffered per-row gathers, bulk byte-counted waits
    run_case(2, n_node=256, emd_size=32, batch=300, tile_b=128, force_dma=True)

    print("KERNEL_OK")
</pallas_src>

<mosaic_0001>
module attributes {stable_mosaic.version = 11 : i64} {
  func.func @_disc_loss_resident_kernel(%arg0: i32, %arg1: memref<24x2xi32, #tpu.memory_space<vmem>>, %arg2: memref<128x128xf32, #tpu.memory_space<vmem>>, %arg3: memref<3x24xf32, #tpu.memory_space<vmem>>, %arg4: memref<1x1xf32, #tpu.memory_space<vmem>>) attributes {dimension_semantics = [#tpu.dimension_semantics<arbitrary>], iteration_bounds = array<i64: 1>, scalar_prefetch = 0 : i64, scratch_operands = 0 : i64, tpu.core_type = #tpu.core_type<tc>, window_params = [{transform_indices = @transform_0, window_bounds = array<i64: 24, 2>}, {pipeline_mode = #tpu.pipeline_mode<synchronous>, transform_indices = @transform_1, window_bounds = array<i64: 128, 128>}, {transform_indices = @transform_2, window_bounds = array<i64: 3, 24>}, {pipeline_mode = #tpu.pipeline_mode<synchronous>, transform_indices = @transform_3, window_bounds = array<i64: 1, 1>}]} {
    %c0_i32 = arith.constant 0 : i32
    %0 = arith.cmpi eq, %arg0, %c0_i32 : i32
    %1 = arith.extui %0 : i1 to i32
    %c0_i32_0 = arith.constant 0 : i32
    %2 = arith.cmpi ne, %1, %c0_i32_0 : i32
    scf.if %2 {
      %cst_25 = arith.constant 0.000000e+00 : f32
      %77 = vector.broadcast %cst_25 : f32 to vector<1x1xf32>
      %c0_26 = arith.constant 0 : index
      %c0_27 = arith.constant 0 : index
      %78 = vector.load %arg4[%c0_26, %c0_27] : memref<1x1xf32, #tpu.memory_space<vmem>>, vector<1x1xf32>
      tpu.vector_store %arg4[%c0_26, %c0_27], %77 {strides = array<i32>} : memref<1x1xf32, #tpu.memory_space<vmem>>, vector<1x1xf32>,
    } else {
    }
    %c0 = arith.constant 0 : index
    %c0_1 = arith.constant 0 : index
    %3 = vector.load %arg1[%c0, %c0_1] : memref<24x2xi32, #tpu.memory_space<vmem>>, vector<24x2xi32>
    %4 = tpu.iota {dimensions = array<i32: 1>} : vector<24x128xi32>
    %c0_2 = arith.constant 0 : index
    %c0_3 = arith.constant 0 : index
    %5 = vector.load %arg2[%c0_2, %c0_3] : memref<128x128xf32, #tpu.memory_space<vmem>>, vector<128x128xf32>
    %6 = vector.extract_strided_slice %3 {offsets = [0, 0], sizes = [24, 1], strides = [1, 1]} : vector<24x2xi32> to vector<24x1xi32>
    %7 = vector.broadcast %6 : vector<24x1xi32> to vector<24x128xi32>
    %8 = arith.cmpi eq, %4, %7 : vector<24x128xi32>
    %9 = arith.extui %8 : vector<24x128xi1> to vector<24x128xi32>
    %10 = arith.sitofp %9 : vector<24x128xi32> to vector<24x128xf32>
    %cst = arith.constant dense<0.000000e+00> : vector<24x128xf32>
    %11 = tpu.matmul %10, %5, %cst {dimension_numbers = #tpu.dot_dimension_numbers<[1], [0], [0], [1], [0, 0, 1, 1], [], []>, precision = #tpu.contract_precision<fp32>} : vector<24x128xf32>, vector<128x128xf32>, vector<24x128xf32> -> vector<24x128xf32>
    %12 = vector.extract_strided_slice %3 {offsets = [0, 1], sizes = [24, 1], strides = [1, 1]} : vector<24x2xi32> to vector<24x1xi32>
    %13 = vector.broadcast %12 : vector<24x1xi32> to vector<24x128xi32>
    %14 = arith.cmpi eq, %4, %13 : vector<24x128xi32>
    %15 = arith.extui %14 : vector<24x128xi1> to vector<24x128xi32>
    %16 = arith.sitofp %15 : vector<24x128xi32> to vector<24x128xf32>
    %cst_4 = arith.constant dense<0.000000e+00> : vector<24x128xf32>
    %17 = tpu.matmul %16, %5, %cst_4 {dimension_numbers = #tpu.dot_dimension_numbers<[1], [0], [0], [1], [0, 0, 1, 1], [], []>, precision = #tpu.contract_precision<fp32>} : vector<24x128xf32>, vector<128x128xf32>, vector<24x128xf32> -> vector<24x128xf32>
    %18 = arith.mulf %11, %11 : vector<24x128xf32>
    %cst_5 = arith.constant dense<0.000000e+00> : vector<24xf32>
    %19 = vector.multi_reduction <add>, %18, %cst_5 [1] : vector<24x128xf32> to vector<24xf32>
    %20 = vector.shape_cast %19 : vector<24xf32> to vector<24x1xf32>
    %cst_6 = arith.constant 1.000000e+00 : f32
    %21 = vector.broadcast %cst_6 : f32 to vector<24x1xf32>
    %22 = arith.cmpf ogt, %20, %21 : vector<24x1xf32>
    %23 = math.rsqrt %20 : vector<24x1xf32>
    %cst_7 = arith.constant 1.000000e+00 : f32
    %24 = vector.broadcast %cst_7 : f32 to vector<24x1xf32>
    %25 = arith.select %22, %23, %24 : vector<24x1xi1>, vector<24x1xf32>
    %26 = vector.broadcast %25 : vector<24x1xf32> to vector<24x128xf32>
    %27 = arith.mulf %11, %26 : vector<24x128xf32>
    %28 = arith.mulf %17, %17 : vector<24x128xf32>
    %cst_8 = arith.constant dense<0.000000e+00> : vector<24xf32>
    %29 = vector.multi_reduction <add>, %28, %cst_8 [1] : vector<24x128xf32> to vector<24xf32>
    %30 = vector.shape_cast %29 : vector<24xf32> to vector<24x1xf32>
    %cst_9 = arith.constant 1.000000e+00 : f32
    %31 = vector.broadcast %cst_9 : f32 to vector<24x1xf32>
    %32 = arith.cmpf ogt, %30, %31 : vector<24x1xf32>
    %33 = math.rsqrt %30 : vector<24x1xf32>
    %cst_10 = arith.constant 1.000000e+00 : f32
    %34 = vector.broadcast %cst_10 : f32 to vector<24x1xf32>
    %35 = arith.select %32, %33, %34 : vector<24x1xi1>, vector<24x1xf32>
    %36 = vector.broadcast %35 : vector<24x1xf32> to vector<24x128xf32>
    %37 = arith.mulf %17, %36 : vector<24x128xf32>
    %38 = arith.mulf %27, %37 : vector<24x128xf32>
    %cst_11 = arith.constant 1.000000e+00 : f32
    %39 = vector.broadcast %cst_11 : f32 to vector<1x128xf32>
    %cst_12 = arith.constant dense<0.000000e+00> : vector<1x24xf32>
    %40 = tpu.matmul %39, %38, %cst_12 {dimension_numbers = #tpu.dot_dimension_numbers<[1], [1], [0], [0], [0, 0, 1, 0], [], []>, precision = #tpu.contract_precision<fp32>} : vector<1x128xf32>, vector<24x128xf32>, vector<1x24xf32> -> vector<1x24xf32>
    %c0_13 = arith.constant 0 : index
    %c0_14 = arith.constant 0 : index
    %41 = vector.load %arg3[%c0_13, %c0_14] : memref<3x24xf32, #tpu.memory_space<vmem>>, vector<3x24xf32>
    %42 = vector.extract_strided_slice %41 {offsets = [0, 0], sizes = [1, 24], strides = [1, 1]} : vector<3x24xf32> to vector<1x24xf32>
    %43 = vector.extract_strided_slice %41 {offsets = [1, 0], sizes = [1, 24], strides = [1, 1]} : vector<3x24xf32> to vector<1x24xf32>
    %44 = vector.extract_strided_slice %41 {offsets = [2, 0], sizes = [1, 24], strides = [1, 1]} : vector<3x24xf32> to vector<1x24xf32>
    %45 = arith.addf %40, %42 : vector<1x24xf32>
    %cst_15 = arith.constant 0.000000e+00 : f32
    %46 = vector.broadcast %cst_15 : f32 to vector<1x24xf32>
    %47 = arith.maximumf %45, %46 : vector<1x24xf32>
    %48 = arith.mulf %45, %43 : vector<1x24xf32>
    %49 = arith.subf %47, %48 : vector<1x24xf32>
    %50 = math.absf %45 : vector<1x24xf32>
    %cst_16 = arith.constant 0.000000e+00 : f32
    %51 = vector.broadcast %cst_16 : f32 to vector<1x24xf32>
    %52 = arith.subf %51, %50 : vector<1x24xf32>
    %53 = math.exp %52 : vector<1x24xf32>
    %54 = math.log1p %53 : vector<1x24xf32>
    %55 = arith.addf %49, %54 : vector<1x24xf32>
    %c0_17 = arith.constant 0 : index
    %c0_18 = arith.constant 0 : index
    %56 = vector.load %arg4[%c0_17, %c0_18] : memref<1x1xf32, #tpu.memory_space<vmem>>, vector<1x1xf32>
    %57 = arith.mulf %55, %44 : vector<1x24xf32>
    %58 = vector.shape_cast %57 : vector<1x24xf32> to vector<1x1x24xf32>
    %cst_19 = arith.constant dense<0.000000e+00> : vector<1xf32>
    %59 = vector.multi_reduction <add>, %58, %cst_19 [1, 2] : vector<1x1x24xf32> to vector<1xf32>
    %60 = vector.shape_cast %59 : vector<1xf32> to vector<1x1x1xf32>
    %61 = vector.extract %60[0, 0, 0] : f32 from vector<1x1x1xf32>
    %62 = vector.broadcast %61 : f32 to vector<1x1xf32>
    %cst_20 = arith.constant 5.000000e-02 : f32
    %63 = vector.broadcast %cst_20 : f32 to vector<1x1xf32>
    %64 = arith.mulf %63, %62 : vector<1x1xf32>
    %65 = arith.mulf %42, %42 : vector<1x24xf32>
    %66 = arith.mulf %65, %44 : vector<1x24xf32>
    %67 = vector.shape_cast %66 : vector<1x24xf32> to vector<1x1x24xf32>
    %cst_21 = arith.constant dense<0.000000e+00> : vector<1xf32>
    %68 = vector.multi_reduction <add>, %67, %cst_21 [1, 2] : vector<1x1x24xf32> to vector<1xf32>
    %69 = vector.shape_cast %68 : vector<1xf32> to vector<1x1x1xf32>
    %70 = vector.extract %69[0, 0, 0] : f32 from vector<1x1x1xf32>
    %71 = vector.broadcast %70 : f32 to vector<1x1xf32>
    %cst_22 = arith.constant 5.000000e-06 : f32
    %72 = vector.broadcast %cst_22 : f32 to vector<1x1xf32>
    %73 = arith.mulf %72, %71 : vector<1x1xf32>
    %74 = arith.addf %64, %73 : vector<1x1xf32>
    %75 = arith.addf %56, %74 : vector<1x1xf32>
    %c0_23 = arith.constant 0 : index
    %c0_24 = arith.constant 0 : index
    %76 = vector.load %arg4[%c0_23, %c0_24] : memref<1x1xf32, #tpu.memory_space<vmem>>, vector<1x1xf32>
    tpu.vector_store %arg4[%c0_23, %c0_24], %75 {strides = array<i32>} : memref<1x1xf32, #tpu.memory_space<vmem>>, vector<1x1xf32>,
    return
  }
  func.func @transform_0(%arg0: i32) -> (i32, i32) {
    %c0_i32 = arith.constant 0 : i32
    %c0_i32_0 = arith.constant 0 : i32
    return %arg0, %c0_i32 : i32, i32
  }
  func.func @transform_1(%arg0: i32) -> (i32, i32) {
    %c0_i32 = arith.constant 0 : i32
    %c0_i32_0 = arith.constant 0 : i32
    %c0_i32_1 = arith.constant 0 : i32
    return %c0_i32, %c0_i32_0 : i32, i32
  }
  func.func @transform_2(%arg0: i32) -> (i32, i32) {
    %c0_i32 = arith.constant 0 : i32
    %c0_i32_0 = arith.constant 0 : i32
    return %c0_i32, %arg0 : i32, i32
  }
  func.func @transform_3(%arg0: i32) -> (i32, i32) {
    %c0_i32 = arith.constant 0 : i32
    %c0_i32_0 = arith.constant 0 : i32
    %c0_i32_1 = arith.constant 0 : i32
    return %c0_i32, %c0_i32_0 : i32, i32
  }
}

</mosaic_0001>

<bundles_post_ra>
// kernel: tpu_custom_call.1
= control target key start
LH: loop header
LB: loop body
LE: loop exit
PB: predicated region body
PF: predicated region fallthrough
CT: control target
= control target key end

     0   :  { %8 = vsyncpa [#allocation3], 0  ;;  %s1961_s0 = inlined_call_operand.vmem [shape: s32[24,2], index: 0, kind: input, shape index: {}]   ;;  %s1962_s1 = inlined_call_operand.hbm [shape: f32[128,128], index: 1, kind: input, shape index: {}]   ;;  %s1963_s2 = inlined_call_operand.vmem [shape: f32[3,24], index: 2, kind: input, shape index: {}]   ;;  %s1964_s3 = inlined_call_operand.hbm [shape: f32[1,1], index: 3, kind: output, shape index: {}]  }
   0x1   :  { %9 = vsyncpa [#allocation4], 0  ;;  %s16_s14 = sshll.u32 %s1962_s1, 4  ;;  %s1340_s15 = smov [#allocation2]   ;;  %s17_s14 = int_to_ptr.hbm [resolvable:$true] %s16_s14 }
   0x2   :  { %s18_s16 = sshll.u32 %s1340_s15, 4  ;;  %s1341_s17 = smov 128   ;;  %s19_s16 = int_to_ptr.vmem [resolvable:$true] %s18_s16 }
   0x3   :  { %s1342_s18 = smov 8  }
   0x4   :  { %24 = dma.hbm_to_vmem [thread:$0]  %s17_s14, 2048, %s19_s16, [#allocation3], %s1341_s17, %s1341_s17, %s1342_s18  }
   0x5   :  { %1336 = dma.done.wait [#allocation3], 2048  }
   0x6   :  { %1337 = vsyncadd [#allocation3], 4294965248  ;;  %v1343_v0 = vmov 0   ;;  %v1965_v1 = vmov 1   ;;  %v37_v2 = vld [vmem:[%s1961_s0] sm:$0xff]  ;;  %v38_v3 = vld [vmem:[%s1961_s0 + $0x8] sm:$0xff] }
   0x7   :  { %1267 = vset.pattern.permute.xlu0 %v1343_v0  ;;  %1268 = vset.pattern.permute.xlu1 %v1343_v0  ;;  %v39_v4 = vld [vmem:[%s1961_s0 + $0x10] sm:$0xff]  ;;  %v57_v5 = vld [vmem:[#allocation2 + $0x78] sm:$0xff]  ;;  %v55_v7 = vld [vmem:[#allocation2 + $0x68] sm:$0xff]  ;;  %s1347_s26 = smov [#allocation5]   ;;  %s1221_s30 = sshll.u32 %s1964_s3, 4  ;;  %s1222_s30 = int_to_ptr.hbm [resolvable:$true] %s1221_s30 }
   0x8   :  { %1270 = vset.pattern.permute.xlu2 %v1965_v1  ;;  %59 = vperm.xlu0 %1267, %v37_v2   ;;  %v56_v6 = vld [vmem:[#allocation2 + $0x70] sm:$0xff]  ;;  %v1381_v8 = vand.u32 4294901760, %v57_v5  ;;  %v1385_v10 = vand.u32 4294901760, %v55_v7  ;;  %v54_v11 = vld [vmem:[#allocation2 + $0x60] sm:$0xff]  ;;  %v53_v12 = vld [vmem:[#allocation2 + $0x58] sm:$0xff]  ;;  %s1219_s27 = sshll.u32 %s1347_s26, 4  ;;  %s1220_s27 = int_to_ptr.vmem [resolvable:$true] %s1219_s27 }
   0x9   :  { %65 = vperm.xlu1 %1268, %v39_v4   ;;  %483 = vperm.xlu2 %1270, %v38_v3   ;;  %v1383_v9 = vand.u32 4294901760, %v56_v6  ;;  %v52_v13 = vld [vmem:[#allocation2 + $0x50] sm:$0xff]  ;;  %v1387_v14 = vand.u32 4294901760, %v54_v11  ;;  %v1389_v15 = vand.u32 4294901760, %v53_v12  ;;  %v51_v17 = vld [vmem:[#allocation2 + $0x48] sm:$0xff]  ;;  %v50_v18 = vld [vmem:[#allocation2 + $0x40] sm:$0xff] }
   0xa   :  { %v1391_v16 = vand.u32 4294901760, %v52_v13  ;;  %v1394_v19 = vsub.f32 %v57_v5, %v1381_v8  ;;  %v1400_v21 = vsub.f32 %v55_v7, %v1385_v10  ;;  %307 = vmatpush.msra.mxu3 %v1381_v8  ;;  %77 = vmatpush.msra.mxu0 %v1381_v8  ;;  %v1404_v22 = vand.u32 4294901760, %v51_v17  ;;  %v49_v38 = vld [vmem:[#allocation2 + $0x38] sm:$0xff]  ;;  %v48_v39 = vld [vmem:[#allocation2 + $0x30] sm:$0xff]  ;;  %v47_v40 = vld [vmem:[#allocation2 + $0x28] sm:$0xff] }
   0xb   :  { %v1397_v20 = vsub.f32 %v56_v6, %v1383_v9  ;;  %v1407_v23 = vsub.f32 %v54_v11, %v1387_v14  ;;  %v1410_v24 = vsub.f32 %v53_v12, %v1389_v15  ;;  %v1415_v26 = vand.u32 4294901760, %v50_v18  ;;  %v46_v46 = vld [vmem:[#allocation2 + $0x20] sm:$0xff]  ;;  %v45_v53 = vld [vmem:[#allocation2 + $0x18] sm:$0xff]  ;;  %v44_v59 = vld [vmem:[#allocation2 + $0x10] sm:$0xff] }
   0xc   :  { %v1413_v25 = vsub.f32 %v52_v13, %v1391_v16  ;;  %v1418_v27 = vand.u32 4294901760, %v1394_v19  ;;  %244 = vmatpush.msra.mxu2 %v1394_v19  ;;  %v1425_v29 = vand.u32 4294901760, %v1400_v21  ;;  %309 = vmatpush.msra.mxu3 %v1383_v9  ;;  %v1436_v32 = vsub.f32 %v51_v17, %v1404_v22  ;;  %v42_v11 = vld [vmem:[#allocation2] sm:$0xff] }
   0xd   :  { %v1421_v28 = vand.u32 4294901760, %v1397_v20  ;;  %v1429_v30 = vand.u32 4294901760, %v1407_v23  ;;  %v1432_v31 = vand.u32 4294901760, %v1410_v24  ;;  %79 = vmatpush.msra.mxu0 %v1383_v9  ;;  %v1451_v37 = vsub.f32 %v50_v18, %v1415_v26 }
   0xe   :  { %v136_v33 = vsub.f32 %v1394_v19, %v1418_v27  ;;  %v148_v35 = vsub.f32 %v1400_v21, %v1425_v29  ;;  %247 = vmatpush.msra.mxu2 %v1397_v20  ;;  %311 = vmatpush.msra.mxu3 %v1385_v10  ;;  %v1448_v36 = vand.u32 4294901760, %v1413_v25  ;;  %v1464_v45 = vand.u32 4294901760, %v1436_v32 }
   0xf   :  { %v142_v34 = vsub.f32 %v1397_v20, %v1421_v28  ;;  %v154_v43 = vsub.f32 %v1407_v23, %v1429_v30  ;;  %v160_v44 = vsub.f32 %v1410_v24, %v1432_v31  ;;  %81 = vmatpush.msra.mxu0 %v1385_v10  ;;  %v1470_v48 = vand.u32 4294901760, %v49_v38 }
  0x10   :  { %62 = vperm.xlu0 %1267, %v38_v3   ;;  %v1453_v41 = vand.u32 4294901760, %v136_v33  ;;  %250 = vmatpush.msra.mxu2 %v1400_v21  ;;  %v1467_v47 = vand.u32 4294901760, %v148_v35  ;;  %v1472_v49 = vand.u32 4294901760, %v48_v39  ;;  %v1474_v50 = vand.u32 4294901760, %v47_v40 }
  0x11   :  { %1269 = vset.pattern.permute.xlu1 %v1965_v1  ;;  %486 = vperm.xlu2 %1270, %v39_v4   ;;  %v1455_v42 = vand.u32 4294901760, %v142_v34  ;;  %v166_v51 = vsub.f32 %v1413_v25, %v1448_v36  ;;  %v1481_v52 = vand.u32 4294901760, %v1451_v37  ;;  %v1484_v54 = vand.u32 4294901760, %v154_v43 }
  0x12   :  { %480 = vperm.xlu1 %1269, %v37_v2   ;;  %313 = vmatpush.msra.mxu3 %v1387_v14  ;;  %v1488_v55 = vsub.f32 %v49_v38, %v1470_v48  ;;  %v1491_v56 = vsub.f32 %v48_v39, %v1472_v49  ;;  %v1493_v57 = vand.u32 4294901760, %v46_v46  ;;  %v172_v58 = vsub.f32 %v1436_v32, %v1464_v45  ;;  %v43_v2 = vld [vmem:[#allocation2 + $0x8] sm:$0xff] }
  0x13   :  { %138 = vmatpush.msra.mxu1 %v1453_v41  ;;  %253 = vmatpush.msra.mxu2 %v1407_v23  ;;  %v1500_v60 = vand.u32 4294901760, %v160_v44  ;;  %v1507_v62 = vsub.f32 %v47_v40, %v1474_v50  ;;  %v1509_v63 = vand.u32 4294901760, %v45_v53  ;;  %v178_v0 = vsub.f32 %v1451_v37, %v1481_v52 }
  0x14   :  { %315 = vmatpush.msra.mxu3 %v1389_v15  ;;  %83 = vmatpush.msra.mxu0 %v1387_v14  ;;  %v1503_v61 = vand.u32 4294901760, %v1488_v55  ;;  %v1516_v3 = vand.u32 4294901760, %v166_v51  ;;  %v1519_v4 = vand.u32 4294901760, %v1491_v56  ;;  %v1523_v5 = vsub.f32 %v46_v46, %v1493_v57 }
  0x15   :  { %144 = vmatpush.msra.mxu1 %v1455_v42  ;;  %256 = vmatpush.msra.mxu2 %v1410_v24  ;;  %v1525_v6 = vand.u32 4294901760, %v44_v59  ;;  %v1527_v7 = vand.u32 4294901760, %v172_v58  ;;  %v1535_v13 = vand.u32 4294901760, %v1507_v62  ;;  %v1539_v17 = vsub.f32 %v45_v53, %v1509_v63 }
  0x16   :  { %317 = vmatpush.msra.mxu3 %v1391_v16  ;;  %85 = vmatpush.msra.mxu0 %v1389_v15  ;;  %1968 = vst [vmem:[#allocation8_spill] sm:$0xff] %v1523_v5  ;;  %v184_v12 = vsub.f32 %v1488_v55, %v1503_v61  ;;  %v1541_v18 = vand.u32 4294901760, %v43_v2  ;;  %v1543_v33 = vand.u32 4294901760, %v178_v0  ;;  %v190_v34 = vsub.f32 %v1491_v56, %v1519_v4 }
  0x17   :  { %150 = vmatpush.msra.mxu1 %v1467_v47  ;;  %259 = vmatpush.msra.mxu2 %v1413_v25  ;;  %1969 = vst [vmem:[#allocation9_spill] sm:$0xff] %v1539_v17  ;;  %v1551_v35 = vand.u32 4294901760, %v1523_v5  ;;  %v1555_v38 = vsub.f32 %v44_v59, %v1525_v6  ;;  %v1557_v39 = vand.u32 4294901760, %v42_v11  ;;  %v196_v43 = vsub.f32 %v1507_v62, %v1535_v13 }
  0x18   :  { %319 = vmatpush.msra.mxu3 %v1404_v22  ;;  %87 = vmatpush.msra.mxu0 %v1391_v16  ;;  %v1562_v40 = vand.u32 4294901760, %v184_v12  ;;  %v1567_v44 = vand.u32 4294901760, %v1539_v17  ;;  %v1571_v46 = vsub.f32 %v43_v2, %v1541_v18  ;;  %v1576_v51 = vand.u32 4294901760, %v190_v34 }
  0x19   :  { %156 = vmatpush.msra.mxu1 %v1484_v54  ;;  %262 = vmatpush.msra.mxu2 %v1436_v32  ;;  %v202_v53 = vsub.f32 %v1523_v5, %v1551_v35  ;;  %v1581_v58 = vand.u32 4294901760, %v1555_v38  ;;  %v1585_v59 = vsub.f32 %v42_v11, %v1557_v39  ;;  %v1590_v0 = vand.u32 4294901760, %v196_v43 }
  0x1a   :  { %321 = vmatpush.msra.mxu3 %v1415_v26  ;;  %89 = vmatpush.msra.mxu0 %v1404_v22  ;;  %v208_v2 = vsub.f32 %v1539_v17, %v1567_v44  ;;  %v1595_v12 = vand.u32 4294901760, %v1571_v46 }
  0x1b   :  { %162 = vmatpush.msra.mxu1 %v1500_v60  ;;  %265 = vmatpush.msra.mxu2 %v1451_v37  ;;  %v1601_v11 = vand.u32 4294901760, %v202_v53  ;;  %v214_v34 = vsub.f32 %v1555_v38, %v1581_v58  ;;  %v1606_v43 = vand.u32 4294901760, %v1585_v59 }
  0x1c   :  { %323 = vmatpush.msra.mxu3 %v1470_v48  ;;  %91 = vmatpush.msra.mxu0 %v1415_v26  ;;  %v1612_v1 = vand.u32 4294901760, %v208_v2  ;;  %v220_v53 = vsub.f32 %v1571_v46, %v1595_v12 }
  0x1d   :  { %168 = vmatpush.msra.mxu1 %v1516_v3  ;;  %268 = vmatpush.msra.mxu2 %v1488_v55 }
  0x1e   :  { %325 = vmatpush.msra.mxu3 %v1472_v49  ;;  %93 = vmatpush.msra.mxu0 %v1470_v48  ;;  %v221_v2 = vand.u32 4294901760, %v220_v53 }
  0x1f   :  { %174 = vmatpush.msra.mxu1 %v1527_v7  ;;  %271 = vmatpush.msra.mxu2 %v1491_v56 }
  0x20   :  { %327 = vmatpush.msra.mxu3 %v1474_v50  ;;  %95 = vmatpush.msra.mxu0 %v1472_v49 }
  0x21   :  { %180 = vmatpush.msra.mxu1 %v1543_v33  ;;  %274 = vmatpush.msra.mxu2 %v1507_v62 }
  0x22   :  { %329 = vmatpush.msra.mxu3 %v1493_v57  ;;  %97 = vmatpush.msra.mxu0 %v1474_v50 }
  0x23   :  { %186 = vmatpush.msra.mxu1 %v1562_v40  ;;  %277 = vmatpush.msra.mxu2 %v1523_v5  ;;  %v1620_v5 = vand.u32 4294901760, %v214_v34 }
  0x24   :  { %331 = vmatpush.msra.mxu3 %v1509_v63  ;;  %99 = vmatpush.msra.mxu0 %v1493_v57 }
  0x25   :  { %192 = vmatpush.msra.mxu1 %v1576_v51  ;;  %280 = vmatpush.msra.mxu2 %v1539_v17  ;;  %v226_v17 = vsub.f32 %v1585_v59, %v1606_v43 }
  0x26   :  { %333 = vmatpush.msra.mxu3 %v1525_v6  ;;  %101 = vmatpush.msra.mxu0 %v1509_v63 }
  0x27   :  { %198 = vmatpush.msra.mxu1 %v1590_v0  ;;  %283 = vmatpush.msra.mxu2 %v1555_v38  ;;  %v227_v34 = vand.u32 4294901760, %v226_v17 }
  0x28   :  { %335 = vmatpush.msra.mxu3 %v1541_v18  ;;  %103 = vmatpush.msra.mxu0 %v1525_v6 }
  0x29   :  { %204 = vmatpush.msra.mxu1 %v1601_v11  ;;  %286 = vmatpush.msra.mxu2 %v1571_v46 }
  0x2a   :  { %337 = vmatpush.msra.mxu3 %v1557_v39  ;;  %105 = vmatpush.msra.mxu0 %v1541_v18 }
  0x2b   :  { %210 = vmatpush.msra.mxu1 %v1612_v1  ;;  %289 = vmatpush.msra.mxu2 %v1585_v59 }
  0x2c   :  { %559 = vmatpush.msrb.mxu3 %v1453_v41  ;;  %107 = vmatpush.msra.mxu0 %v1557_v39  ;;  %v40_v41 = vlaneseq }
  0x2d   :  { %216 = vmatpush.msra.mxu1 %v1620_v5  ;;  %498 = vmatpush.msrb.mxu2 %v1381_v8 }
  0x2e   :  { %565 = vmatpush.msrb.mxu3 %v1455_v42  ;;  %360 = vmatpush.msrb.mxu0 %v1418_v27  ;;  %v1695_v42 = vand.u32 127, %v40_v41 }
  0x2f   :  { %222 = vmatpush.msra.mxu1 %v221_v2  ;;  %500 = vmatpush.msrb.mxu2 %v1383_v9 }
  0x30   :  { %571 = vmatpush.msrb.mxu3 %v1467_v47  ;;  %364 = vmatpush.msrb.mxu0 %v1421_v28 }
  0x31   :  { %228 = vmatpush.msra.mxu1 %v227_v34  ;;  %502 = vmatpush.msrb.mxu2 %v1385_v10 }
  0x32   :  { %577 = vmatpush.msrb.mxu3 %v1484_v54  ;;  %368 = vmatpush.msrb.mxu0 %v1425_v29 }
  0x33   :  { %435 = vmatpush.msrb.mxu1 %v1381_v8  ;;  %504 = vmatpush.msrb.mxu2 %v1387_v14 }
  0x34   :  { %583 = vmatpush.msrb.mxu3 %v1500_v60  ;;  %372 = vmatpush.msrb.mxu0 %v1429_v30  ;;  %v1345_v60 = vmov 1.0  }
  0x35   :  { %437 = vmatpush.msrb.mxu1 %v1383_v9  ;;  %506 = vmatpush.msrb.mxu2 %v1389_v15 }
  0x36   :  { %589 = vmatpush.msrb.mxu3 %v1516_v3  ;;  %376 = vmatpush.msrb.mxu0 %v1432_v31  ;;  %v1346_v3 = vmov 0.0  }
  0x37   :  { %439 = vmatpush.msrb.mxu1 %v1385_v10  ;;  %508 = vmatpush.msrb.mxu2 %v1391_v16 }
  0x38   :  { %595 = vmatpush.msrb.mxu3 %v1527_v7  ;;  %380 = vmatpush.msrb.mxu0 %v1448_v36 }
  0x39   :  { %441 = vmatpush.msrb.mxu1 %v1387_v14  ;;  %510 = vmatpush.msrb.mxu2 %v1404_v22 }
  0x3a   :  { %601 = vmatpush.msrb.mxu3 %v1543_v33  ;;  %384 = vmatpush.msrb.mxu0 %v1464_v45 }
  0x3b   :  { %443 = vmatpush.msrb.mxu1 %v1389_v15  ;;  %512 = vmatpush.msrb.mxu2 %v1415_v26 }
  0x3c   :  { %607 = vmatpush.msrb.mxu3 %v1562_v40  ;;  %388 = vmatpush.msrb.mxu0 %v1481_v52 }
  0x3d   :  { %445 = vmatpush.msrb.mxu1 %v1391_v16  ;;  %514 = vmatpush.msrb.mxu2 %v1470_v48 }
  0x3e   :  { %613 = vmatpush.msrb.mxu3 %v1576_v51  ;;  %392 = vmatpush.msrb.mxu0 %v1503_v61 }
  0x3f   :  { %447 = vmatpush.msrb.mxu1 %v1404_v22  ;;  %516 = vmatpush.msrb.mxu2 %v1472_v49 }
  0x40   :  { %619 = vmatpush.msrb.mxu3 %v1590_v0  ;;  %396 = vmatpush.msrb.mxu0 %v1519_v4 }
  0x41   :  { %449 = vmatpush.msrb.mxu1 %v1415_v26  ;;  %518 = vmatpush.msrb.mxu2 %v1474_v50 }
  0x42   :  { %625 = vmatpush.msrb.mxu3 %v1601_v11  ;;  %400 = vmatpush.msrb.mxu0 %v1535_v13 }
  0x43   :  { %451 = vmatpush.msrb.mxu1 %v1470_v48  ;;  %520 = vmatpush.msrb.mxu2 %v1493_v57 }
  0x44   :  { %631 = vmatpush.msrb.mxu3 %v1612_v1  ;;  %404 = vmatpush.msrb.mxu0 %v1551_v35  ;;  %v1970_v1 = vmov 1  }
  0x45   :  { %453 = vmatpush.msrb.mxu1 %v1472_v49  ;;  %522 = vmatpush.msrb.mxu2 %v1509_v63 }
  0x46   :  { %637 = vmatpush.msrb.mxu3 %v1620_v5  ;;  %408 = vmatpush.msrb.mxu0 %v1567_v44 }
  0x47   :  { %455 = vmatpush.msrb.mxu1 %v1474_v50  ;;  %524 = vmatpush.msrb.mxu2 %v1525_v6 }
  0x48   :  { %643 = vmatpush.msrb.mxu3 %v221_v2  ;;  %412 = vmatpush.msrb.mxu0 %v1581_v58 }
  0x49   :  { %457 = vmatpush.msrb.mxu1 %v1493_v57  ;;  %526 = vmatpush.msrb.mxu2 %v1541_v18 }
  0x4a   :  { %649 = vmatpush.msrb.mxu3 %v227_v34  ;;  %416 = vmatpush.msrb.mxu0 %v1595_v12 }
  0x4b   :  { %459 = vmatpush.msrb.mxu1 %v1509_v63  ;;  %528 = vmatpush.msrb.mxu2 %v1557_v39 }
  0x4c   :  { %1271 = vset.pattern.permute.xlu0 %v1970_v1  ;;  %420 = vmatpush.msrb.mxu0 %v1606_v43 }
  0x4d   :  { %461 = vmatpush.msrb.mxu1 %v1525_v6 }
  0x4f   :  { %463 = vmatpush.msrb.mxu1 %v1541_v18 }
  0x51   :  { %465 = vmatpush.msrb.mxu1 %v1557_v39 }
  0x63   :  { %v1746_v53 = vpop.permute.xlu2 %483 }
  0x64   :  { %vm489_vm4 = vcmp.eq.s32.totalorder %v1695_v42, %v1746_v53 }
  0x7a   :  { %v1697_v47 = vpop.permute.xlu0 %59 }
  0x7b   :  { %v1699_v54 = vpop.permute.xlu1 %65  ;;  %vm67_vm0 = vcmp.eq.s32.totalorder %v1695_v42, %v1697_v47 }
  0x7c   :  { %1234 = vmatmul.msk.f32.vlgmr.msra.gmra.mxu1 %vm67_vm0, %v1345_v60  ;;  %v1231_v5 = vsel %vm67_vm0, 1.0, %v1346_v3  ;;  %vm69_vm1 = vcmp.eq.s32.totalorder %v1695_v42, %v1699_v54 }
  0x7d   :  { %v109_v7 = vsub.f32 %v1231_v5, %v1231_v5  ;;  %728 = vmatpush.msra.mxu1 %v1381_v8 }
  0x7f   :  { %292 = vmatmul.f32.vlgmr.msra.gmra.mxu2 %v109_v7  ;;  %v110_v17 = vand.u32 4294901760, %v109_v7  ;;  %730 = vmatpush.msra.mxu1 %v1383_v9 }
  0x80   :  { %781 = vmatpush.msra.mxu2 %v1418_v27 }
  0x81   :  { %341 = vmatmul.f32.vlgmr.msra.gmra.mxu3 %v110_v17  ;;  %v111_v33 = vsub.f32 %v109_v7, %v110_v17  ;;  %732 = vmatpush.msra.mxu1 %v1385_v10 }
  0x82   :  { %v1717_v40 = vpop.permute.xlu0 %62  ;;  %785 = vmatpush.msra.mxu2 %v1421_v28  ;;  %856 = vmatpush.msra.mxu3 %v1381_v8  ;;  %v1233_v8 = vsel %vm69_vm1, 1.0, %v1346_v3 }
  0x83   :  { %vm68_vm2 = vcmp.eq.s32.totalorder %v1695_v42, %v1717_v40  ;;  %v112_v51 = vand.u32 4294901760, %v111_v33  ;;  %734 = vmatpush.msra.mxu1 %v1387_v14 }
  0x84   :  { %v1723_v0 = vpop.permute.xlu1 %480  ;;  %1235 = vmatmul.msk.f32.gmra.mxu1 %vm68_vm2, %v1345_v60  ;;  %v1232_v27 = vsel %vm68_vm2, 1.0, %v1346_v3  ;;  %789 = vmatpush.msra.mxu2 %v1425_v29  ;;  %v125_v29 = vsub.f32 %v1233_v8, %v1233_v8 }
  0x85   :  { %vm488_vm3 = vcmp.eq.s32.totalorder %v1695_v42, %v1723_v0  ;;  %113 = vmatmul.f32.vlgmr.msra.gmra.mxu0 %v112_v51  ;;  %v117_v28 = vsub.f32 %v1232_v27, %v1232_v27  ;;  %858 = vmatpush.msra.mxu3 %v1383_v9 }
  0x86   :  { %v1243_v11 = vsel %vm488_vm3, 1.0, %v1346_v3  ;;  %736 = vmatpush.msra.mxu1 %v1389_v15  ;;  %665 = vmatpush.msra.mxu0 %v1394_v19  ;;  %v126_v19 = vand.u32 4294901760, %v125_v29 }
  0x87   :  { %297 = vmatmul.f32.gmra.mxu2 %v117_v28  ;;  %v118_v2 = vand.u32 4294901760, %v117_v28  ;;  %v1750_v34 = vsub.f32 %v1243_v11, %v1243_v11  ;;  %860 = vmatpush.msra.mxu3 %v1385_v10  ;;  %v1244_v10 = vsel %vm489_vm4, 1.0, %v1346_v3 }
  0x88   :  { %793 = vmatpush.msra.mxu2 %v1429_v30  ;;  %738 = vmatpush.msra.mxu1 %v1391_v16  ;;  %v1781_v30 = vpop.permute.xlu2 %486 }
  0x89   :  { %347 = vmatmul.f32.gmra.mxu3 %v118_v2  ;;  %v119_v1 = vsub.f32 %v117_v28, %v118_v2  ;;  %668 = vmatpush.msra.mxu0 %v1397_v20  ;;  %v531_v41 = vand.u32 4294901760, %v1750_v34  ;;  %v127_v20 = vsub.f32 %v125_v29, %v126_v19  ;;  %vm490_vm5 = vcmp.eq.s32.totalorder %v1695_v42, %v1781_v30 }
  0x8a   :  { %797 = vmatpush.msra.mxu2 %v1432_v31  ;;  %862 = vmatpush.msra.mxu3 %v1387_v14  ;;  %v1775_v14 = vsub.f32 %v1244_v10, %v1244_v10 }
  0x8b   :  { %v120_v9 = vand.u32 4294901760, %v119_v1  ;;  %740 = vmatpush.msra.mxu1 %v1404_v22  ;;  %671 = vmatpush.msra.mxu0 %v1400_v21  ;;  %v532_v21 = vsub.f32 %v1750_v34, %v531_v41 }
  0x8c   :  { %1236 = vmatmul.msk.f32.gmra.mxu1 %vm69_vm1, %v1345_v60  ;;  %801 = vmatpush.msra.mxu2 %v1448_v36  ;;  %v1971_v36 = vld [vmem:[#allocation8_spill] sm:$0xff] }
  0x8d   :  { %121 = vmatmul.f32.gmra.mxu0 %v120_v9  ;;  %864 = vmatpush.msra.mxu3 %v1389_v15  ;;  %v128_v15 = vand.u32 4294901760, %v127_v20 }
  0x8e   :  { %742 = vmatpush.msra.mxu1 %v1415_v26  ;;  %674 = vmatpush.msra.mxu0 %v1407_v23  ;;  %v533_v23 = vand.u32 4294901760, %v532_v21 }
  0x8f   :  { %302 = vmatmul.f32.gmra.mxu2 %v125_v29  ;;  %866 = vmatpush.msra.mxu3 %v1391_v16  ;;  %v539_v16 = vand.u32 4294901760, %v1775_v14 }
  0x90   :  { %805 = vmatpush.msra.mxu2 %v1464_v45  ;;  %744 = vmatpush.msra.mxu1 %v1470_v48  ;;  %v1972_v45 = vld [vmem:[#allocation9_spill] sm:$0xff] }
  0x91   :  { %353 = vmatmul.f32.gmra.mxu3 %v126_v19  ;;  %677 = vmatpush.msra.mxu0 %v1410_v24  ;;  %v540_v24 = vsub.f32 %v1775_v14, %v539_v16 }
  0x92   :  { %809 = vmatpush.msra.mxu2 %v1481_v52  ;;  %868 = vmatpush.msra.mxu3 %v1404_v22  ;;  %v1245_v22 = vsel %vm490_vm5, 1.0, %v1346_v3 }
  0x93   :  { %746 = vmatpush.msra.mxu1 %v1472_v49  ;;  %680 = vmatpush.msra.mxu0 %v1413_v25  ;;  %v546_v25 = vsub.f32 %v1245_v22, %v1245_v22 }
  0x94   :  { %1240 = vmatmul.msk.f32.vlgmr.msrb.gmra.mxu1 %vm67_vm0, %v1345_v60  ;;  %813 = vmatpush.msra.mxu2 %v1503_v61 }
  0x95   :  { %129 = vmatmul.f32.gmra.mxu0 %v128_v15  ;;  %870 = vmatpush.msra.mxu3 %v1415_v26  ;;  %v541_v26 = vand.u32 4294901760, %v540_v24  ;;  %v547_v31 = vand.u32 4294901760, %v546_v25 }
  0x96   :  { %748 = vmatpush.msra.mxu1 %v1474_v50  ;;  %683 = vmatpush.msra.mxu0 %v1436_v32 }
  0x97   :  { %534 = vmatmul.f32.vlgmr.msrb.gmra.mxu2 %v533_v23  ;;  %872 = vmatpush.msra.mxu3 %v1470_v48  ;;  %v548_v32 = vsub.f32 %v546_v25, %v547_v31 }
  0x98   :  { %817 = vmatpush.msra.mxu2 %v1519_v4  ;;  %750 = vmatpush.msra.mxu1 %v1493_v57 }
  0x99   :  { %1246 = vmatmul.msk.f32.vlgmr.msrb.gmra.mxu3 %vm488_vm3, %v1345_v60  ;;  %686 = vmatpush.msra.mxu0 %v1451_v37  ;;  %v549_v37 = vand.u32 4294901760, %v548_v32 }
  0x9a   :  { %821 = vmatpush.msra.mxu2 %v1535_v13  ;;  %874 = vmatpush.msra.mxu3 %v1472_v49 }
  0x9b   :  { %752 = vmatpush.msra.mxu1 %v1509_v63  ;;  %689 = vmatpush.msra.mxu0 %v1488_v55 }
  0x9c   :  { %1241 = vmatmul.msk.f32.gmra.mxu1 %vm68_vm2, %v1345_v60  ;;  %825 = vmatpush.msra.mxu2 %v1551_v35 }
  0x9d   :  { %1237 = vmatmul.msk.f32.vlgmr.msrb.gmra.mxu0 %vm67_vm0, %v1345_v60  ;;  %876 = vmatpush.msra.mxu3 %v1474_v50 }
  0x9e   :  { %754 = vmatpush.msra.mxu1 %v1525_v6  ;;  %692 = vmatpush.msra.mxu0 %v1491_v56 }
  0x9f   :  { %542 = vmatmul.f32.gmra.mxu2 %v541_v26  ;;  %878 = vmatpush.msra.mxu3 %v1493_v57 }
  0xa0   :  { %829 = vmatpush.msra.mxu2 %v1567_v44  ;;  %756 = vmatpush.msra.mxu1 %v1541_v18 }
  0xa1   :  { %1247 = vmatmul.msk.f32.gmra.mxu3 %vm489_vm4, %v1345_v60  ;;  %695 = vmatpush.msra.mxu0 %v1507_v62 }
  0xa2   :  { %833 = vmatpush.msra.mxu2 %v1581_v58  ;;  %880 = vmatpush.msra.mxu3 %v1509_v63 }
  0xa3   :  { %758 = vmatpush.msra.mxu1 %v1557_v39  ;;  %698 = vmatpush.msra.mxu0 %v1971_v36 }
  0xa4   :  { %1242 = vmatmul.msk.f32.gmra.mxu1 %vm69_vm1, %v1345_v60  ;;  %837 = vmatpush.msra.mxu2 %v1595_v12 }
  0xa5   :  { %1238 = vmatmul.msk.f32.gmra.mxu0 %vm68_vm2, %v1345_v60  ;;  %882 = vmatpush.msra.mxu3 %v1525_v6 }
  0xa6   :  { %701 = vmatpush.msra.mxu0 %v1972_v45  ;;  %841 = vmatpush.msra.mxu2 %v1606_v43 }
  0xa7   :  { %550 = vmatmul.f32.gmra.mxu2 %v549_v37  ;;  %884 = vmatpush.msra.mxu3 %v1541_v18 }
  0xa8   :  { %704 = vmatpush.msra.mxu0 %v1555_v38 }
  0xa9   :  { %1248 = vmatmul.msk.f32.gmra.mxu3 %vm490_vm5, %v1345_v60 }
  0xaa   :  { %886 = vmatpush.msra.mxu3 %v1557_v39  ;;  %707 = vmatpush.msra.mxu0 %v1571_v46 }
  0xac   :  { %762 = vmatmul.f32.vlgmr.msra.gmra.mxu1 %v531_v41  ;;  %710 = vmatpush.msra.mxu0 %v1585_v59 }
  0xad   :  { %1239 = vmatmul.msk.f32.gmra.mxu0 %vm69_vm1, %v1345_v60 }
  0xaf   :  { %1249 = vmatmul.msk.f32.vlgmr.msra.gmra.mxu2 %vm488_vm3, %v1345_v60 }
  0xb1   :  { %1252 = vmatmul.msk.f32.vlgmr.msra.gmra.mxu3 %vm488_vm3, %v1345_v60 }
  0xb4   :  { %768 = vmatmul.f32.gmra.mxu1 %v539_v16 }
  0xb5   :  { %713 = vmatmul.f32.vlgmr.msra.gmra.mxu0 %v1750_v34 }
  0xb7   :  { %1250 = vmatmul.msk.f32.gmra.mxu2 %vm489_vm4, %v1345_v60 }
  0xb9   :  { %1253 = vmatmul.msk.f32.gmra.mxu3 %vm489_vm4, %v1345_v60 }
  0xbc   :  { %774 = vmatmul.f32.gmra.mxu1 %v547_v31 }
  0xbd   :  { %718 = vmatmul.f32.gmra.mxu0 %v1775_v14 }
  0xbf   :  { %1251 = vmatmul.msk.f32.gmra.mxu2 %vm490_vm5, %v1345_v60 }
  0xc1   :  { %1254 = vmatmul.msk.f32.gmra.mxu3 %vm490_vm5, %v1345_v60 }
  0xc5   :  { %723 = vmatmul.f32.gmra.mxu0 %v546_v25 }
  0xf9   :  { %v231_v48 = vpop.f32.mrf.mxu1 }
 0x101   :  { %v235_v49 = vpop.f32.mrf.mxu1 }
 0x102   :  { %v114_v50 = vpop.f32.mrf.mxu0  ;;  %v293_v52 = vpop.f32.mrf.mxu2 }
 0x103   :  { %v232_v54 = vadd.f32 %v231_v48, %v114_v50 }
 0x104   :  { %v342_v55 = vpop.f32.mrf.mxu3 }
 0x105   :  { %v294_v40 = vadd.f32 %v293_v52, %v232_v54 }
 0x107   :  { %v343_v11 = vadd.f32 %v342_v55, %v294_v40 }
 0x109   :  { %v239_v56 = vpop.f32.mrf.mxu1 }
 0x10a   :  { %v122_v57 = vpop.f32.mrf.mxu0  ;;  %v298_v61 = vpop.f32.mrf.mxu2 }
 0x10b   :  { %v236_v18 = vadd.f32 %v235_v49, %v122_v57 }
 0x10c   :  { %v348_v62 = vpop.f32.mrf.mxu3 }
 0x10d   :  { %v299_v46 = vadd.f32 %v298_v61, %v236_v18 }
 0x10f   :  { %v349_v58 = vadd.f32 %v348_v62, %v299_v46 }
 0x111   :  { %v468_v63 = vpop.f32.mrf.mxu1 }
 0x112   :  { %v130_v4 = vpop.f32.mrf.mxu0  ;;  %v303_v6 = vpop.f32.mrf.mxu2 }
 0x113   :  { %v240_v59 = vadd.f32 %v239_v56, %v130_v4 }
 0x114   :  { %v354_v13 = vpop.f32.mrf.mxu3 }
 0x115   :  { %v304_v5 = vadd.f32 %v303_v6, %v240_v59 }
 0x117   :  { %v355_v51 = vadd.f32 %v354_v13, %v304_v5 }
 0x119   :  { %v472_v39 = vpop.f32.mrf.mxu1 }
 0x11a   :  { %v423_v35 = vpop.f32.mrf.mxu0  ;;  %v535_v38 = vpop.f32.mrf.mxu2 }
 0x11b   :  { %v424_v2 = vadd.f32 %v423_v35, %v343_v11 }
 0x11c   :  { %v652_v44 = vpop.f32.mrf.mxu3 }
 0x11d   :  { %v1903_v19 = vadd.f32 %v468_v63, %v424_v2  ;;  %v653_v24 = vadd.f32 %v652_v44, %v535_v38 }
 0x11f   :  { %v900_v10 = vmul.f32 %v1903_v19, %v1903_v19 }
 0x121   :  { %v476_v17 = vpop.f32.mrf.mxu1 }
 0x122   :  { %v427_v12 = vpop.f32.mrf.mxu0  ;;  %v543_v43 = vpop.f32.mrf.mxu2 }
 0x123   :  { %v428_v42 = vadd.f32 %v427_v12, %v349_v58 }
 0x124   :  { %v656_v47 = vpop.f32.mrf.mxu3 }
 0x125   :  { %v1895_v7 = vadd.f32 %v472_v39, %v428_v42  ;;  %v657_v14 = vadd.f32 %v656_v47, %v543_v43 }
 0x127   :  { %v901_v33 = vmul.f32 %v1895_v7, %v1895_v7 }
 0x129   :  { %905 = vadd.xlane.f32.xlu2 %v901_v33  ;;  %v763_v29 = vpop.f32.mrf.mxu1 }
 0x12a   :  { %v431_v0 = vpop.f32.mrf.mxu0  ;;  %v551_v27 = vpop.f32.mrf.mxu2 }
 0x12b   :  { %v432_v8 = vadd.f32 %v431_v0, %v355_v51 }
 0x12c   :  { %v660_v28 = vpop.f32.mrf.mxu3 }
 0x12d   :  { %v1899_v53 = vadd.f32 %v476_v17, %v432_v8  ;;  %v661_v25 = vadd.f32 %v660_v28, %v551_v27 }
 0x12f   :  { %v902_v34 = vmul.f32 %v1899_v53, %v1899_v53 }
 0x131   :  { %907 = vadd.xlane.f32.xlu0 %v902_v34  ;;  %v769_v20 = vpop.f32.mrf.mxu1 }
 0x132   :  { %v714_v1 = vpop.f32.mrf.mxu0  ;;  %v844_v9 = vpop.f32.mrf.mxu2 }
 0x133   :  { %v715_v32 = vadd.f32 %v714_v1, %v653_v24 }
 0x134   :  { %v889_v41 = vpop.f32.mrf.mxu3 }
 0x135   :  { %v764_v50 = vadd.f32 %v763_v29, %v715_v32 }
 0x137   :  { %v845_v57 = vadd.f32 %v844_v9, %v764_v50 }
 0x139   :  { %903 = vadd.xlane.f32.xlu0 %v900_v10  ;;  %v775_v45 = vpop.f32.mrf.mxu1  ;;  %v1915_v62 = vadd.f32 %v889_v41, %v845_v57 }
 0x13a   :  { %v719_v21 = vpop.f32.mrf.mxu0  ;;  %v848_v15 = vpop.f32.mrf.mxu2 }
 0x13b   :  { %v720_v30 = vadd.f32 %v719_v21, %v657_v14  ;;  %v948_v63 = vmul.f32 %v1915_v62, %v1915_v62 }
 0x13c   :  { %v893_v16 = vpop.f32.mrf.mxu3 }
 0x13d   :  { %v770_v23 = vadd.f32 %v769_v20, %v720_v30 }
 0x13f   :  { %v849_v22 = vadd.f32 %v848_v15, %v770_v23 }
 0x141   :  { %v1907_v26 = vadd.f32 %v893_v16, %v849_v22 }
 0x142   :  { %v724_v31 = vpop.f32.mrf.mxu0  ;;  %v852_v49 = vpop.f32.mrf.mxu2 }
 0x143   :  { %v725_v36 = vadd.f32 %v724_v31, %v661_v25  ;;  %v949_v37 = vmul.f32 %v1907_v26, %v1907_v26 }
 0x144   :  { %v897_v55 = vpop.f32.mrf.mxu3 }
 0x145   :  { %v776_v48 = vadd.f32 %v775_v45, %v725_v36  ;;  %953 = vadd.xlane.f32.xlu2 %v949_v37 }
 0x147   :  { %v853_v52 = vadd.f32 %v852_v49, %v776_v48 }
 0x149   :  { %v1911_v56 = vadd.f32 %v897_v55, %v853_v52 }
 0x14b   :  { %v950_v61 = vmul.f32 %v1911_v56, %v1911_v56 }
 0x14d   :  { %955 = vadd.xlane.f32.xlu1 %v950_v61 }
 0x155   :  { %951 = vadd.xlane.f32.xlu1 %v948_v63 }
 0x19c   :  { %v906_v4 = vpop.xlane.xlu2 %905 }
 0x19d   :  { %1272 = vrsqrt.f32 %v906_v4  ;;  %vm928_vm7 = vweird.f32 %v906_v4  ;;  %vm910_vm10 = vcmp.gt.f32.partialorder %v906_v4, 1.0 }
 0x1a3   :  { %v1273_v13 = vpop.eup %1272 }
 0x1a4   :  { %v1919_v6 = vpop.xlane.xlu0 %907  ;;  %v923_v18 = vmul.f32 %v1273_v13, %v906_v4  ;;  %vm929_vm6 = vweird.f32 %v1273_v13 }
 0x1a5   :  { %1274 = vrsqrt.f32 %v1919_v6  ;;  %vm930_vm8 = vmor %vm928_vm7, %vm929_vm6  ;;  %vm938_vm15 = vweird.f32 %v1919_v6  ;;  %vm911_vm2 = vcmp.gt.f32.partialorder %v1919_v6, 1.0 }
 0x1a6   :  { %v924_v39 = vmul.f32 %v1273_v13, %v923_v18 }
 0x1a8   :  { %v925_v58 = vmul.f32 0.5, %v924_v39 }
 0x1aa   :  { %v926_v43 = vsub.f32 1.5, %v925_v58 }
 0x1ab   :  { %v1275_v38 = vpop.eup %1274 }
 0x1ac   :  { %v1922_v35 = vpop.xlane.xlu0 %903  ;;  %v933_v46 = vmul.f32 %v1275_v38, %v1919_v6  ;;  %v927_v17 = vmul.f32 %v1273_v13, %v926_v43  ;;  %vm939_vm12 = vweird.f32 %v1275_v38 }
 0x1ad   :  { %1276 = vrsqrt.f32 %v1922_v35  ;;  %vm940_vm0 = vmor %vm938_vm15, %vm939_vm12  ;;  %vm918_vm7 = vweird.f32 %v1922_v35 }
 0x1ae   :  { %v934_v59 = vmul.f32 %v1275_v38, %v933_v46  ;;  %v931_v27 = vsel %vm930_vm8, %v1273_v13, %v927_v17 }
 0x1af   :  { %v943_v1 = vsel %vm910_vm10, %v931_v27, 1.0  ;;  %vm909_vm10 = vcmp.gt.f32.partialorder %v1922_v35, 1.0 }
 0x1b0   :  { %v935_v5 = vmul.f32 0.5, %v934_v59  ;;  %v946_v15 = vmul.f32 %v943_v1, %v1895_v7 }
 0x1b2   :  { %v936_v0 = vsub.f32 1.5, %v935_v5  ;;  %v999_v5 = vld [vmem:[%s1963_s2] sm:$0x7] }
 0x1b3   :  { %v1926_v12 = vpop.eup %1276  ;;  %v1180_v17 = vrot.slane %v999_v5, 2 }
 0x1b4   :  { %v913_v33 = vmul.f32 %v1926_v12, %v1922_v35  ;;  %v937_v9 = vmul.f32 %v1275_v38, %v936_v0  ;;  %vm919_vm4 = vweird.f32 %v1926_v12 }
 0x1b5   :  { %vm920_vm8 = vmor %vm918_vm7, %vm919_vm4 }
 0x1b6   :  { %v914_v8 = vmul.f32 %v1926_v12, %v913_v33  ;;  %v941_v23 = vsel %vm940_vm0, %v1275_v38, %v937_v9  ;;  %v1196_v33 = vmul.f32 %v999_v5, %v999_v5  ;;  %vm35_vm0 = vcmask 0  }
 0x1b7   :  { %v944_v36 = vsel %vm911_vm2, %v941_v23, 1.0  ;;  %v1161_v23 = vrot.slane %v999_v5, 1  ;;  %36 = vst.msk [vmem:[#allocation5] sm:$0x1] %vm35_vm0, %v1346_v3 }
 0x1b8   :  { %v954_v44 = vpop.xlane.xlu2 %953  ;;  %v915_v41 = vmul.f32 0.5, %v914_v8  ;;  %v947_v48 = vmul.f32 %v944_v36, %v1899_v53 }
 0x1b9   :  { %1278 = vrsqrt.f32 %v954_v44  ;;  %vm976_vm11 = vweird.f32 %v954_v44  ;;  %vm958_vm14 = vcmp.gt.f32.partialorder %v954_v44, 1.0 }
 0x1ba   :  { %v916_v16 = vsub.f32 1.5, %v915_v41 }
 0x1bf   :  { %v1279_v42 = vpop.eup %1278 }
 0x1c0   :  { %v971_v47 = vmul.f32 %v1279_v42, %v954_v44  ;;  %v956_v54 = vpop.xlane.xlu1 %955  ;;  %vm977_vm9 = vweird.f32 %v1279_v42 }
 0x1c1   :  { %1280 = vrsqrt.f32 %v956_v54  ;;  %vm978_vm13 = vmor %vm976_vm11, %vm977_vm9  ;;  %vm986_vm3 = vweird.f32 %v956_v54  ;;  %vm959_vm6 = vcmp.gt.f32.partialorder %v956_v54, 1.0 }
 0x1c2   :  { %v972_v40 = vmul.f32 %v1279_v42, %v971_v47 }
 0x1c4   :  { %v973_v51 = vmul.f32 0.5, %v972_v40  ;;  %v1197_v40 = vmul.f32 %v1196_v33, %v1180_v17 }
 0x1c6   :  { %v974_v28 = vsub.f32 1.5, %v973_v51 }
 0x1c7   :  { %v1281_v11 = vpop.eup %1280 }
 0x1c8   :  { %v975_v2 = vmul.f32 %v1279_v42, %v974_v28  ;;  %v981_v34 = vmul.f32 %v1281_v11, %v956_v54  ;;  %v952_v29 = vpop.xlane.xlu1 %951  ;;  %vm987_vm1 = vweird.f32 %v1281_v11 }
 0x1c9   :  { %1282 = vrsqrt.f32 %v952_v29  ;;  %vm988_vm5 = vmor %vm986_vm3, %vm987_vm1  ;;  %vm966_vm11 = vweird.f32 %v952_v29 }
 0x1ca   :  { %v979_v10 = vsel %vm978_vm13, %v1279_v42, %v975_v2  ;;  %v982_v14 = vmul.f32 %v1281_v11, %v981_v34  ;;  %vm957_vm13 = vcmp.gt.f32.partialorder %v952_v29, 1.0 }
 0x1cb   :  { %v991_v20 = vsel %vm958_vm14, %v979_v10, 1.0  ;;  %vm1183_vm14 = vcmask 188416  }
 0x1cc   :  { %v994_v21 = vmul.f32 %v991_v20, %v1907_v26  ;;  %v983_v30 = vmul.f32 0.5, %v982_v14  ;;  %v917_v26 = vmul.f32 %v1926_v12, %v916_v16  ;;  %v1198_v51 = vsel %vm1183_vm14, %v1197_v40, 0.0 }
 0x1cd   :  { %1199 = vadd.xlane.f32.xlu0 %v1198_v51 }
 0x1ce   :  { %v984_v22 = vsub.f32 1.5, %v983_v30  ;;  %v997_v32 = vmul.f32 %v994_v21, %v946_v15  ;;  %v921_v55 = vsel %vm920_vm8, %v1926_v12, %v917_v26 }
 0x1cf   :  { %v1283_v24 = vpop.eup %1282  ;;  %v942_v13 = vsel %vm909_vm10, %v921_v55, 1.0 }
 0x1d0   :  { %v985_v25 = vmul.f32 %v1281_v11, %v984_v22  ;;  %v961_v31 = vmul.f32 %v1283_v24, %v952_v29  ;;  %v1015_v52 = vand.u32 4294901760, %v997_v32  ;;  %vm967_vm9 = vweird.f32 %v1283_v24 }
 0x1d1   :  { %vm968_vm12 = vmor %vm966_vm11, %vm967_vm9  ;;  %v945_v38 = vmul.f32 %v942_v13, %v1903_v19 }
 0x1d2   :  { %v989_v7 = vsel %vm988_vm5, %v1281_v11, %v985_v25  ;;  %v962_v37 = vmul.f32 %v1283_v24, %v961_v31  ;;  %v1043_v6 = vsub.f32 %v997_v32, %v1015_v52 }
 0x1d3   :  { %v992_v45 = vsel %vm959_vm6, %v989_v7, 1.0 }
 0x1d4   :  { %v995_v49 = vmul.f32 %v992_v45, %v1911_v56  ;;  %v963_v50 = vmul.f32 0.5, %v962_v37  ;;  %v1044_v46 = vand.u32 4294901760, %v1043_v6 }
 0x1d6   :  { %v964_v57 = vsub.f32 1.5, %v963_v50  ;;  %v998_v61 = vmul.f32 %v995_v49, %v947_v48  ;;  %v1045_v43 = vsub.f32 %v1043_v6, %v1044_v46 }
 0x1d8   :  { %v965_v63 = vmul.f32 %v1283_v24, %v964_v57  ;;  %v1013_v4 = vand.u32 4294901760, %v998_v61  ;;  %v1046_v19 = vand.u32 4294901760, %v1045_v43 }
 0x1da   :  { %v969_v53 = vsel %vm968_vm12, %v1283_v24, %v965_v63  ;;  %1014 = vmatpush.xpose.msrb.mxu0 %v1013_v4  ;;  %1098 = vmatpush.xpose.msrb.mxu3 %v1013_v4  ;;  %v1037_v56 = vsub.f32 %v998_v61, %v1013_v4 }
 0x1db   :  { %v990_v18 = vsel %vm957_vm13, %v969_v53, 1.0 }
 0x1dc   :  { %v993_v39 = vmul.f32 %v990_v18, %v1915_v62  ;;  %1073 = vmatpush.xpose.msrb.mxu2 %v1037_v56  ;;  %v1038_v44 = vand.u32 4294901760, %v1037_v56 }
 0x1de   :  { %v996_v35 = vmul.f32 %v993_v39, %v945_v38  ;;  %1016 = vmatpush.xpose.msrb.mxu0 %v1015_v52  ;;  %1100 = vmatpush.xpose.msrb.mxu3 %v1015_v52  ;;  %v1039_v58 = vsub.f32 %v1037_v56, %v1038_v44 }
 0x1e0   :  { %1076 = vmatpush.xpose.msrb.mxu2 %v1043_v6  ;;  %v1017_v59 = vand.u32 4294901760, %v996_v35  ;;  %v1040_v12 = vand.u32 4294901760, %v1039_v58  ;;  %v1179_v58 = vld [vmem:[#allocation5] sm:$0x1] }
 0x1e2   :  { %1018 = vmatpush.xpose.msrb.mxu0 %v1017_v59  ;;  %1041 = vmatpush.xpose.msrb.mxu1 %v1040_v12  ;;  %v1049_v42 = vsub.f32 %v996_v35, %v1017_v59 }
 0x1e3   :  { %1102 = vmatpush.xpose.msrb.mxu3 %v1017_v59 }
 0x1e4   :  { %1079 = vmatpush.xpose.msrb.mxu2 %v1049_v42  ;;  %v1050_v47 = vand.u32 4294901760, %v1049_v42 }
 0x1e5   :  { %1019 = vmatmul.f32.vlgmr.msrb.gmra.mxu0 %v1346_v3 }
 0x1e6   :  { %1123 = vmatpush.xpose.msra.mxu0 %v1038_v44  ;;  %1047 = vmatpush.xpose.msrb.mxu1 %v1046_v19  ;;  %v1051_v62 = vsub.f32 %v1049_v42, %v1050_v47 }
 0x1e7   :  { %1103 = vmatmul.f32.vlgmr.msrb.gmra.mxu3 %v1346_v3  ;;  %1080 = vmatmul.f32.vlgmr.msrb.gmra.mxu2 %v1346_v3 }
 0x1e8   :  { %v1052_v54 = vand.u32 4294901760, %v1051_v62 }
 0x1ea   :  { %1127 = vmatpush.xpose.msra.mxu0 %v1044_v46  ;;  %1053 = vmatpush.xpose.msrb.mxu1 %v1052_v54 }
 0x1ed   :  { %1054 = vmatmul.f32.vlgmr.msrb.gmra.mxu1 %v1345_v60 }
 0x1ee   :  { %1131 = vmatpush.xpose.msra.mxu0 %v1050_v47  ;;  %1150 = vmatpush.xpose.msra.mxu1 %v1013_v4 }
 0x1f1   :  { %1132 = vmatmul.f32.vlgmr.msra.gmra.mxu0 %v1345_v60 }
 0x1f2   :  { %1152 = vmatpush.xpose.msra.mxu1 %v1015_v52 }
 0x1f6   :  { %1154 = vmatpush.xpose.msra.mxu1 %v1017_v59 }
 0x1f9   :  { %1155 = vmatmul.f32.vlgmr.msra.gmra.mxu1 %v1345_v60 }
 0x240   :  { %v1200_v49 = vpop.xlane.xlu0 %1199 }
 0x241   :  { %v1201_v50 = vrot.slane %v1200_v49, 4 }
 0x243   :  { %v1202_v52 = vadd.f32 %v1201_v50, %v1200_v49 }
 0x245   :  { %v1203_v57 = vrot.slane %v1202_v52, 2 }
 0x247   :  { %v1204_v4 = vadd.f32 %v1203_v57, %v1202_v52 }
 0x249   :  { %v1205_v53 = vrot.slane %v1204_v4, 1 }
 0x24b   :  { %v1206_v38 = vadd.f32 %v1205_v53, %v1204_v4 }
 0x262   :  { %v1020_v0 = vpop.f32.mrf.mxu0 }
 0x263   :  { %v1021_v27 = vadd.f32 %v1020_v0, %v999_v5 }
 0x26a   :  { %v1055_v8 = vpop.f32.mrf.mxu1  ;;  %v1081_v28 = vpop.f32.mrf.mxu2 }
 0x26b   :  { %v1056_v11 = vadd.f32 %v1055_v8, %v1021_v27  ;;  %v1104_v2 = vpop.f32.mrf.mxu3 }
 0x26d   :  { %v1082_v34 = vadd.f32 %v1081_v28, %v1056_v11 }
 0x26e   :  { %v1133_v29 = vpop.f32.mrf.mxu0 }
 0x26f   :  { %v1105_v60 = vadd.f32 %v1104_v2, %v1082_v34 }
 0x271   :  { %v1134_v1 = vadd.f32 %v1133_v29, %v1105_v60 }
 0x276   :  { %v1156_v9 = vpop.f32.mrf.mxu1 }
 0x277   :  { %v1157_v41 = vadd.f32 %v1156_v9, %v1134_v1 }
 0x279   :  { %v1165_v10 = vand.u32 2147483647, %v1157_v41  ;;  %v1159_v22 = vmax.f32 %v1157_v41, 0.0  ;;  %v1163_v24 = vmul.f32 %v1161_v23, %v1157_v41 }
 0x27b   :  { %v1166_v14 = vsub.f32 0.0, %v1165_v10  ;;  %v1164_v26 = vsub.f32 %v1159_v22, %v1163_v24 }
 0x27d   :  { %v1167_v20 = vmul.f32 1.442695, %v1166_v14 }
 0x27f   :  { %1284 = vpow2.f32 %v1167_v20 }
 0x285   :  { %v1285_v21 = vpop.eup %1284 }
 0x286   :  { %v1169_v30 = vadd.f32 1.0, %v1285_v21  ;;  %v1172_v15 = vmul.f32 -0.5, %v1285_v21  ;;  %v1175_v25 = vand.u32 2147483647, %v1285_v21 }
 0x288   :  { %1286 = vlog2.f32 %v1169_v30  ;;  %v1173_v16 = vadd.f32 1.0, %v1172_v15  ;;  %vm1176_vm15 = vcmp.lt.f32.partialorder %v1175_v25, 0.0004427343 }
 0x28a   :  { %v1174_v36 = vmul.f32 %v1285_v21, %v1173_v16 }
 0x28e   :  { %v1287_v31 = vpop.eup %1286 }
 0x28f   :  { %v1171_v32 = vmul.f32 0.6931472, %v1287_v31 }
 0x291   :  { %v1177_v7 = vsel %vm1176_vm15, %v1174_v36, %v1171_v32 }
 0x292   :  { %v1178_v37 = vadd.f32 %v1177_v7, %v1164_v26 }
 0x294   :  { %v1182_v45 = vmul.f32 %v1180_v17, %v1178_v37 }
 0x296   :  { %v1184_v48 = vsel %vm1183_vm14, %v1182_v45, 0.0 }
 0x297   :  { %1185 = vadd.xlane.f32.xlu2 %v1184_v48 }
 0x30a   :  { %v1186_v55 = vpop.xlane.xlu2 %1185 }
 0x30b   :  { %v1187_v61 = vrot.slane %v1186_v55, 4 }
 0x30d   :  { %v1188_v63 = vadd.f32 %v1187_v61, %v1186_v55 }
 0x30f   :  { %v1189_v6 = vrot.slane %v1188_v63, 2 }
 0x311   :  { %v1190_v13 = vadd.f32 %v1189_v6, %v1188_v63 }
 0x313   :  { %v1191_v56 = vrot.slane %v1190_v13, 1 }
 0x315   :  { %v1192_v18 = vadd.f32 %v1191_v56, %v1190_v13 }
 0x317   :  { %1255 = vpush %v1192_v18 }
 0x318   :  { %1257 = vpush %v1206_v38 }
 0x348   :  { %s1256_s2 = spop %1255 }
 0x349   :  { %v1194_v39 = vstv %s1256_s2  ;;  %s1258_s25 = spop %1257 }
 0x34a   :  { %v1195_v44 = vmul.f32 0.05, %v1194_v39  ;;  %v1208_v46 = vstv %s1258_s25 }
 0x34b   :  { %v1209_v35 = vmul.f32 5e-06, %v1208_v46 }
 0x34d   :  { %v1210_v59 = vadd.f32 %v1209_v35, %v1195_v44 }
 0x34f   :  { %v1211_v12 = vadd.f32 %v1210_v59, %v1179_v58 }
 0x351   :  { %1213 = vst.msk [vmem:[#allocation5] sm:$0x1] %vm35_vm0, %v1211_v12 }
 0x352   :  { %1224 = dma.vmem_to_hbm [thread:$0]  %s1220_s27, 16, %s1222_s30, [#allocation4]  }
 0x353   :  { %1338 = dma.done.wait [#allocation4], 16  }
 0x354   :  { %1339 = vsyncadd [#allocation4], 4294967280 }
 0x355   :  { %1229 = vsyncpa [#allocation3], 1 }
 0x356   :  { %1230 = vsyncpa [#allocation4], 1 }

</bundles_post_ra>
